<compile_context>
chip_gen: v6e
topology: v6e:2x2x1
jax: 0.10.0
libtpu: 0.0.40
codegen_flags: <defaults>
</compile_context>

<pallas_src>
import math
import functools

import jax
import jax.numpy as jnp
from jax.experimental import pallas as pl
from jax.experimental.pallas import tpu as pltpu


_VMEM_LIMIT = 32 * 1024 * 1024  # explicit scoped-VMEM budget (safe on v5e/v6e/v7x)


def _round_up(x, m):
    return ((x + m - 1) // m) * m


def _pad2d(x, rows, cols, value=0):
    r, c = x.shape
    if r == rows and c == cols:
        return x
    return jnp.pad(x, ((0, rows - r), (0, cols - c)), constant_values=value)


# --------------------------------------------------------------------------- #
# Kernel 1: row L2-normalization (F.normalize semantics), bf16 output.
# --------------------------------------------------------------------------- #
def _normalize_rows_kernel(x_ref, o_ref):
    x = x_ref[...]                                       # (TR, D) f32
    sumsq = jnp.sum(x * x, axis=1, keepdims=True)
    inv = jax.lax.rsqrt(jnp.maximum(sumsq, 1e-24))       # == 1 / max(||x||, 1e-12)
    o_ref[...] = (x * inv).astype(o_ref.dtype)


def _normalize_rows_bf16(x, row_tile):
    rows, d = x.shape
    return pl.pallas_call(
        _normalize_rows_kernel,
        grid=(rows // row_tile,),
        in_specs=[pl.BlockSpec((row_tile, d), lambda i: (i, 0))],
        out_specs=pl.BlockSpec((row_tile, d), lambda i: (i, 0)),
        out_shape=jax.ShapeDtypeStruct((rows, d), jnp.bfloat16),
        compiler_params=pltpu.CompilerParams(
            dimension_semantics=("parallel",),
            vmem_limit_bytes=_VMEM_LIMIT),
    )(x)


# --------------------------------------------------------------------------- #
# Kernel 2: tiled logits matmul (bf16 -> f32) fused with B_avg partial sums.
# --------------------------------------------------------------------------- #
def _logits_bsum_kernel(s_ref, xn_ref, wn_ref, labels_ref,
                        logits_ref, bsum_ref, *, n_rows, n_cols, tb, tc):
    i = pl.program_id(0)
    j = pl.program_id(1)

    # MXU: bf16 operands, f32 accumulation.  (TB, D) @ (TC, D)^T -> (TB, TC)
    logits = jax.lax.dot_general(
        xn_ref[...], wn_ref[...], (((1,), (1,)), ((), ())),
        preferred_element_type=jnp.float32)
    logits_ref[...] = logits

    # bsum output block is revisited across the class ("arbitrary") axis and
    # serves as the accumulator (init at j == 0, auto-writeback on last j).
    @pl.when(j == 0)
    def _():
        bsum_ref[...] = jnp.zeros_like(bsum_ref)

    labels = labels_ref[...]                              # (TB, 1) int32
    col = jax.lax.broadcasted_iota(jnp.int32, (tb, tc), 1) + j * tc
    row = jax.lax.broadcasted_iota(jnp.int32, (tb, tc), 0) + i * tb
    include = (col != labels) & (col < n_cols) & (row < n_rows)
    b = jnp.where(include, s_ref[0] * jnp.exp(logits), 0.0)
    # per-row partial sums, accumulated across class tiles (lane-broadcast add)
    bsum_ref[...] += jnp.sum(b, axis=1, keepdims=True)


# --------------------------------------------------------------------------- #
# Kernel 3: fused clamp / margin / one-hot mix / rescale by the new s.
# --------------------------------------------------------------------------- #
def _mix_scale_kernel(s_ref, logits_ref, labels_ref, out_ref, *, cos_m, sin_m, tc):
    j = pl.program_id(1)
    logits = logits_ref[...]                              # (TB, TC) f32
    clamped = jnp.clip(logits, -1.0 + 1e-7, 1.0 - 1e-7)
    # cos(acos(c) + m) = c*cos(m) - sqrt(1 - c^2)*sin(m)
    target = clamped * cos_m - jnp.sqrt(1.0 - clamped * clamped) * sin_m

    labels = labels_ref[...]                              # (TB, 1) int32
    col = jax.lax.broadcasted_iota(jnp.int32, logits.shape, 1) + j * tc
    one_hot = (col == labels).astype(jnp.float32)

    out_ref[...] = (logits * (1.0 - one_hot) + target * one_hot) * s_ref[0]


# --------------------------------------------------------------------------- #
# Forward wrapper.
# --------------------------------------------------------------------------- #
@functools.partial(jax.jit, static_argnames=("margin", "n_classes"))
def adacos_forward(embeddings, labels, W, *, margin, n_classes, s=None):
    B, D = embeddings.shape
    C, D2 = W.shape
    assert D2 == D and C == n_classes
    if s is None:
        s = math.sqrt(2.0) * math.log(n_classes - 1)
    s_old = jnp.asarray(s, jnp.float32).reshape(1)

    # Tile sizes: batch tiles multiple of 8, class tiles multiple of 128 (lane
    # dense), full (padded) D contraction per block.  Sized well under 32 MiB
    # scoped VMEM so they are safe on v7x's 64 MiB as well as v5e/v6e.
    TB = min(256, _round_up(B, 8))
    TC = min(512, _round_up(C, 128))
    Bp = _round_up(B, TB)
    Cp = _round_up(C, TC)
    Dp = _round_up(D, 128)
    nb, nc = Bp // TB, Cp // TC

    x_p = _pad2d(embeddings.astype(jnp.float32), Bp, Dp)
    w_p = _pad2d(W.astype(jnp.float32), Cp, Dp)
    labels_p = jnp.pad(labels.astype(jnp.int32).reshape(B, 1),
                       ((0, Bp - B), (0, 0)), constant_values=-1)

    # --- K1: normalize once, stream bf16 into the matmul kernel --------------
    xn = _normalize_rows_bf16(x_p, TB)
    wn = _normalize_rows_bf16(w_p, TC)

    # --- K2: logits + masked B_avg partial sums ------------------------------
    logits_p, bsum = pl.pallas_call(
        functools.partial(_logits_bsum_kernel,
                          n_rows=B, n_cols=C, tb=TB, tc=TC),
        grid=(nb, nc),
        in_specs=[
            pl.BlockSpec(memory_space=pltpu.MemorySpace.SMEM),     # s_old
            pl.BlockSpec((TB, Dp), lambda i, j: (i, 0)),           # xn
            pl.BlockSpec((TC, Dp), lambda i, j: (j, 0)),           # wn
            pl.BlockSpec((TB, 1), lambda i, j: (i, 0)),            # labels
        ],
        out_specs=[
            pl.BlockSpec((TB, TC), lambda i, j: (i, j)),           # logits
            pl.BlockSpec((TB, 128), lambda i, j: (i, 0)),          # bsum rows
        ],
        out_shape=[
            jax.ShapeDtypeStruct((Bp, Cp), jnp.float32),
            jax.ShapeDtypeStruct((Bp, 128), jnp.float32),
        ],
        compiler_params=pltpu.CompilerParams(
            dimension_semantics=("parallel", "arbitrary"),
            vmem_limit_bytes=_VMEM_LIMIT),
    )(s_old, xn, wn, labels_p)

    # --- adaptive-scale update (torch.no_grad block), tiny scalar math -------
    logits = logits_p[:B, :C]
    clamped = jnp.clip(logits, -1.0 + 1e-7, 1.0 - 1e-7)
    n = B * C
    # torch.median(theta) (lower median) == arccos of the n//2-th smallest
    # clamped logit, since arccos is strictly decreasing.
    theta_med = jnp.arccos(jnp.sort(clamped.reshape(-1))[n // 2])
    B_avg = jnp.sum(bsum[:, 0]) / B
    s_new = jnp.log(B_avg) / jnp.cos(
        jnp.minimum(jnp.float32(math.pi / 4.0), theta_med))

    # --- K3: fused margin mixing + rescale by the NEW s, aliased onto logits -
    s_new_arr = s_new.astype(jnp.float32).reshape(1)
    out_p = pl.pallas_call(
        functools.partial(_mix_scale_kernel,
                          cos_m=math.cos(margin), sin_m=math.sin(margin), tc=TC),
        grid=(nb, nc),
        in_specs=[
            pl.BlockSpec(memory_space=pltpu.MemorySpace.SMEM),     # s_new
            pl.BlockSpec((TB, TC), lambda i, j: (i, j)),           # logits
            pl.BlockSpec((TB, 1), lambda i, j: (i, 0)),            # labels
        ],
        out_specs=pl.BlockSpec((TB, TC), lambda i, j: (i, j)),
        out_shape=jax.ShapeDtypeStruct((Bp, Cp), jnp.float32),
        input_output_aliases={1: 0},
        compiler_params=pltpu.CompilerParams(
            dimension_semantics=("parallel", "parallel"),
            vmem_limit_bytes=_VMEM_LIMIT),
    )(s_new_arr, logits_p, labels_p)

    output = out_p[:B, :C]
    # TODO(synk): `index is not None` branch (permuted / mixup one-hot) of the
    # PyTorch module is not implemented; this covers the default index=None path.
    return output, s_new


# --------------------------------------------------------------------------- #
# Pure-JAX reference (exact PyTorch semantics, f32 matmul) for self-check.
# --------------------------------------------------------------------------- #
def adacos_reference(embeddings, labels, W, *, margin, n_classes, s=None):
    if s is None:
        s = math.sqrt(2.0) * math.log(n_classes - 1)
    x = embeddings / jnp.maximum(
        jnp.linalg.norm(embeddings, axis=1, keepdims=True), 1e-12)
    Wn = W / jnp.maximum(jnp.linalg.norm(W, axis=1, keepdims=True), 1e-12)
    logits = x @ Wn.T
    theta = jnp.arccos(jnp.clip(logits, -1.0 + 1e-7, 1.0 - 1e-7))
    target_logits = jnp.cos(theta + margin)
    one_hot = jax.nn.one_hot(labels, n_classes, dtype=logits.dtype)
    output = logits * (1.0 - one_hot) + target_logits * one_hot
    B_avg = jnp.where(one_hot < 1, s * jnp.exp(logits), 0.0)    # NOTE: s*exp(logits), as in the given module
    B_avg = jnp.sum(B_avg) / embeddings.shape[0]
    n = logits.size
    theta_med = jnp.sort(theta.reshape(-1))[(n - 1) // 2]       # torch lower median
    s_new = jnp.log(B_avg) / jnp.cos(
        jnp.minimum(jnp.float32(math.pi / 4.0), theta_med))
    return output * s_new, s_new


if __name__ == "__main__":
    # config.embedding_dim = 32, config.num_model_number = 16, margin = 0.5
    B, D, C = 8, 32, 16
    margin = 0.5

    key = jax.random.PRNGKey(0)
    k_emb, k_w, k_lab = jax.random.split(key, 3)

    embeddings = jax.random.normal(k_emb, (B, D), dtype=jnp.float32)
    labels = jax.random.randint(k_lab, (B,), 0, C, dtype=jnp.int32)

    # xavier_uniform_ for W of shape (n_classes, num_features)
    bound = math.sqrt(6.0 / (D + C))
    W = jax.random.uniform(k_w, (C, D), minval=-bound, maxval=bound,
                           dtype=jnp.float32)

    output, s_new = adacos_forward(embeddings, labels, W,
                                   margin=margin, n_classes=C)
    jax.block_until_ready(output)
    jax.block_until_ready(s_new)

    assert output.shape == (B, C) and output.dtype == jnp.float32

    ref_out, ref_s = adacos_reference(embeddings, labels, W,
                                      margin=margin, n_classes=C)
    max_err = float(jnp.max(jnp.abs(output - ref_out)))
    s_err = abs(float(s_new) - float(ref_s))
    assert max_err < 0.1, f"output mismatch: max_err={max_err}"
    assert s_err < 0.1, f"s mismatch: {s_err}"

    print("KERNEL_OK")
</pallas_src>

<mosaic_0001>
module attributes {stable_mosaic.version = 11 : i64} {
  func.func @_normalize_rows_kernel(%arg0: i32, %arg1: memref<8x128xf32, #tpu.memory_space<vmem>>, %arg2: memref<8x128xbf16, #tpu.memory_space<vmem>>) attributes {dimension_semantics = [#tpu.dimension_semantics<parallel>], iteration_bounds = array<i64: 1>, scalar_prefetch = 0 : i64, scratch_operands = 0 : i64, tpu.core_type = #tpu.core_type<tc>, window_params = [{transform_indices = @transform_0, window_bounds = array<i64: 8, 128>}, {transform_indices = @transform_1, window_bounds = array<i64: 8, 128>}]} {
    %c0 = arith.constant 0 : index
    %c0_0 = arith.constant 0 : index
    %0 = vector.load %arg1[%c0, %c0_0] : memref<8x128xf32, #tpu.memory_space<vmem>>, vector<8x128xf32>
    %1 = arith.mulf %0, %0 : vector<8x128xf32>
    %cst = arith.constant dense<0.000000e+00> : vector<8xf32>
    %2 = vector.multi_reduction <add>, %1, %cst [1] : vector<8x128xf32> to vector<8xf32>
    %3 = vector.shape_cast %2 : vector<8xf32> to vector<8x1xf32>
    %cst_1 = arith.constant 1.000000e-24 : f32
    %4 = vector.broadcast %cst_1 : f32 to vector<8x1xf32>
    %5 = arith.maximumf %3, %4 : vector<8x1xf32>
    %6 = math.rsqrt %5 : vector<8x1xf32>
    %7 = vector.broadcast %6 : vector<8x1xf32> to vector<8x128xf32>
    %8 = arith.mulf %0, %7 : vector<8x128xf32>
    %9 = arith.truncf %8 : vector<8x128xf32> to vector<8x128xbf16>
    %c0_2 = arith.constant 0 : index
    %c0_3 = arith.constant 0 : index
    %10 = vector.load %arg2[%c0_2, %c0_3] : memref<8x128xbf16, #tpu.memory_space<vmem>>, vector<8x128xbf16>
    tpu.vector_store %arg2[%c0_2, %c0_3], %9 {strides = array<i32>} : memref<8x128xbf16, #tpu.memory_space<vmem>>, vector<8x128xbf16>,
    return
  }
  func.func @transform_0(%arg0: i32) -> (i32, i32) {
    %c0_i32 = arith.constant 0 : i32
    %c0_i32_0 = arith.constant 0 : i32
    return %arg0, %c0_i32 : i32, i32
  }
  func.func @transform_1(%arg0: i32) -> (i32, i32) {
    %c0_i32 = arith.constant 0 : i32
    %c0_i32_0 = arith.constant 0 : i32
    return %arg0, %c0_i32 : i32, i32
  }
}

module attributes {stable_mosaic.version = 11 : i64} {
  func.func @_normalize_rows_kernel(%arg0: i32, %arg1: memref<128x128xf32, #tpu.memory_space<vmem>>, %arg2: memref<128x128xbf16, #tpu.memory_space<vmem>>) attributes {dimension_semantics = [#tpu.dimension_semantics<parallel>], iteration_bounds = array<i64: 1>, scalar_prefetch = 0 : i64, scratch_operands = 0 : i64, tpu.core_type = #tpu.core_type<tc>, window_params = [{transform_indices = @transform_0, window_bounds = array<i64: 128, 128>}, {transform_indices = @transform_1, window_bounds = array<i64: 128, 128>}]} {
    %c0 = arith.constant 0 : index
    %c0_0 = arith.constant 0 : index
    %0 = vector.load %arg1[%c0, %c0_0] : memref<128x128xf32, #tpu.memory_space<vmem>>, vector<128x128xf32>
    %1 = arith.mulf %0, %0 : vector<128x128xf32>
    %cst = arith.constant dense<0.000000e+00> : vector<128xf32>
    %2 = vector.multi_reduction <add>, %1, %cst [1] : vector<128x128xf32> to vector<128xf32>
    %3 = vector.shape_cast %2 : vector<128xf32> to vector<128x1xf32>
    %cst_1 = arith.constant 1.000000e-24 : f32
    %4 = vector.broadcast %cst_1 : f32 to vector<128x1xf32>
    %5 = arith.maximumf %3, %4 : vector<128x1xf32>
    %6 = math.rsqrt %5 : vector<128x1xf32>
    %7 = vector.broadcast %6 : vector<128x1xf32> to vector<128x128xf32>
    %8 = arith.mulf %0, %7 : vector<128x128xf32>
    %9 = arith.truncf %8 : vector<128x128xf32> to vector<128x128xbf16>
    %c0_2 = arith.constant 0 : index
    %c0_3 = arith.constant 0 : index
    %10 = vector.load %arg2[%c0_2, %c0_3] : memref<128x128xbf16, #tpu.memory_space<vmem>>, vector<128x128xbf16>
    tpu.vector_store %arg2[%c0_2, %c0_3], %9 {strides = array<i32>} : memref<128x128xbf16, #tpu.memory_space<vmem>>, vector<128x128xbf16>,
    return
  }
  func.func @transform_0(%arg0: i32) -> (i32, i32) {
    %c0_i32 = arith.constant 0 : i32
    %c0_i32_0 = arith.constant 0 : i32
    return %arg0, %c0_i32 : i32, i32
  }
  func.func @transform_1(%arg0: i32) -> (i32, i32) {
    %c0_i32 = arith.constant 0 : i32
    %c0_i32_0 = arith.constant 0 : i32
    return %arg0, %c0_i32 : i32, i32
  }
}

module attributes {stable_mosaic.version = 11 : i64} {
  func.func @_logits_bsum_kernel(%arg0: i32, %arg1: i32, %arg2: memref<1xf32, #tpu.memory_space<smem>>, %arg3: memref<8x128xbf16, #tpu.memory_space<vmem>>, %arg4: memref<128x128xbf16, #tpu.memory_space<vmem>>, %arg5: memref<8x1xi32, #tpu.memory_space<vmem>>, %arg6: memref<8x128xf32, #tpu.memory_space<vmem>>, %arg7: memref<8x128xf32, #tpu.memory_space<vmem>>) attributes {dimension_semantics = [#tpu.dimension_semantics<parallel>, #tpu.dimension_semantics<arbitrary>], iteration_bounds = array<i64: 1, 1>, scalar_prefetch = 0 : i64, scratch_operands = 0 : i64, tpu.core_type = #tpu.core_type<tc>, window_params = [{transform_indices = @transform_0, window_bounds = array<i64: 1>}, {transform_indices = @transform_1, window_bounds = array<i64: 8, 128>}, {transform_indices = @transform_2, window_bounds = array<i64: 128, 128>}, {transform_indices = @transform_3, window_bounds = array<i64: 8, 1>}, {transform_indices = @transform_4, window_bounds = array<i64: 8, 128>}, {transform_indices = @transform_5, window_bounds = array<i64: 8, 128>}]} {
    %c0 = arith.constant 0 : index
    %c0_0 = arith.constant 0 : index
    %0 = vector.load %arg3[%c0, %c0_0] : memref<8x128xbf16, #tpu.memory_space<vmem>>, vector<8x128xbf16>
    %c0_1 = arith.constant 0 : index
    %c0_2 = arith.constant 0 : index
    %1 = vector.load %arg4[%c0_1, %c0_2] : memref<128x128xbf16, #tpu.memory_space<vmem>>, vector<128x128xbf16>
    %cst = arith.constant dense<0.000000e+00> : vector<8x128xf32>
    %2 = tpu.matmul %0, %1, %cst {dimension_numbers = #tpu.dot_dimension_numbers<[1], [1], [0], [0], [0, 0, 1, 0], [], []>} : vector<8x128xbf16>, vector<128x128xbf16>, vector<8x128xf32> -> vector<8x128xf32>
    %c0_3 = arith.constant 0 : index
    %c0_4 = arith.constant 0 : index
    %3 = vector.load %arg6[%c0_3, %c0_4] : memref<8x128xf32, #tpu.memory_space<vmem>>, vector<8x128xf32>
    tpu.vector_store %arg6[%c0_3, %c0_4], %2 {strides = array<i32>} : memref<8x128xf32, #tpu.memory_space<vmem>>, vector<8x128xf32>,
    %c0_i32 = arith.constant 0 : i32
    %4 = arith.cmpi eq, %arg1, %c0_i32 : i32
    %5 = arith.extui %4 : i1 to i32
    %c0_i32_5 = arith.constant 0 : i32
    %6 = arith.cmpi ne, %5, %c0_i32_5 : i32
    scf.if %6 {
      %cst_16 = arith.constant 0.000000e+00 : f32
      %36 = vector.broadcast %cst_16 : f32 to vector<8x128xf32>
      %c0_17 = arith.constant 0 : index
      %c0_18 = arith.constant 0 : index
      %37 = vector.load %arg7[%c0_17, %c0_18] : memref<8x128xf32, #tpu.memory_space<vmem>>, vector<8x128xf32>
      tpu.vector_store %arg7[%c0_17, %c0_18], %36 {strides = array<i32>} : memref<8x128xf32, #tpu.memory_space<vmem>>, vector<8x128xf32>,
    } else {
    }
    %c0_6 = arith.constant 0 : index
    %c0_7 = arith.constant 0 : index
    %7 = vector.load %arg5[%c0_6, %c0_7] : memref<8x1xi32, #tpu.memory_space<vmem>>, vector<8x1xi32>
    %8 = tpu.iota {dimensions = array<i32: 1>} : vector<8x128xi32>
    %c128_i32 = arith.constant 128 : i32
    %9 = arith.muli %arg1, %c128_i32 : i32
    %10 = vector.broadcast %9 : i32 to vector<8x128xi32>
    %11 = arith.addi %8, %10 : vector<8x128xi32>
    %12 = tpu.iota {dimensions = array<i32: 0>} : vector<8x128xi32>
    %c8_i32 = arith.constant 8 : i32
    %13 = arith.muli %arg0, %c8_i32 : i32
    %14 = vector.broadcast %13 : i32 to vector<8x128xi32>
    %15 = arith.addi %12, %14 : vector<8x128xi32>
    %16 = vector.broadcast %7 : vector<8x1xi32> to vector<8x128xi32>
    %17 = arith.cmpi ne, %11, %16 : vector<8x128xi32>
    %c16_i32 = arith.constant 16 : i32
    %18 = vector.broadcast %c16_i32 : i32 to vector<8x128xi32>
    %19 = arith.cmpi slt, %11, %18 : vector<8x128xi32>
    %20 = arith.andi %17, %19 : vector<8x128xi1>
    %c8_i32_8 = arith.constant 8 : i32
    %21 = vector.broadcast %c8_i32_8 : i32 to vector<8x128xi32>
    %22 = arith.cmpi slt, %15, %21 : vector<8x128xi32>
    %23 = arith.andi %20, %22 : vector<8x128xi1>
    %c0_9 = arith.constant 0 : index
    %24 = memref.load %arg2[%c0_9] : memref<1xf32, #tpu.memory_space<smem>>
    %25 = math.exp %2 : vector<8x128xf32>
    %26 = vector.broadcast %24 : f32 to vector<8x128xf32>
    %27 = arith.mulf %26, %25 : vector<8x128xf32>
    %cst_10 = arith.constant 0.000000e+00 : f32
    %28 = vector.broadcast %cst_10 : f32 to vector<8x128xf32>
    %29 = arith.select %23, %27, %28 : vector<8x128xi1>, vector<8x128xf32>
    %c0_11 = arith.constant 0 : index
    %c0_12 = arith.constant 0 : index
    %30 = vector.load %arg7[%c0_11, %c0_12] : memref<8x128xf32, #tpu.memory_space<vmem>>, vector<8x128xf32>
    %cst_13 = arith.constant dense<0.000000e+00> : vector<8xf32>
    %31 = vector.multi_reduction <add>, %29, %cst_13 [1] : vector<8x128xf32> to vector<8xf32>
    %32 = vector.shape_cast %31 : vector<8xf32> to vector<8x1xf32>
    %33 = vector.broadcast %32 : vector<8x1xf32> to vector<8x128xf32>
    %34 = arith.addf %30, %33 : vector<8x128xf32>
    %c0_14 = arith.constant 0 : index
    %c0_15 = arith.constant 0 : index
    %35 = vector.load %arg7[%c0_14, %c0_15] : memref<8x128xf32, #tpu.memory_space<vmem>>, vector<8x128xf32>
    tpu.vector_store %arg7[%c0_14, %c0_15], %34 {strides = array<i32>} : memref<8x128xf32, #tpu.memory_space<vmem>>, vector<8x128xf32>,
    return
  }
  func.func @transform_0(%arg0: i32, %arg1: i32) -> i32 {
    %c0_i32 = arith.constant 0 : i32
    %c0_i32_0 = arith.constant 0 : i32
    return %c0_i32 : i32
  }
  func.func @transform_1(%arg0: i32, %arg1: i32) -> (i32, i32) {
    %c0_i32 = arith.constant 0 : i32
    %c0_i32_0 = arith.constant 0 : i32
    return %arg0, %c0_i32 : i32, i32
  }
  func.func @transform_2(%arg0: i32, %arg1: i32) -> (i32, i32) {
    %c0_i32 = arith.constant 0 : i32
    %c0_i32_0 = arith.constant 0 : i32
    return %arg1, %c0_i32 : i32, i32
  }
  func.func @transform_3(%arg0: i32, %arg1: i32) -> (i32, i32) {
    %c0_i32 = arith.constant 0 : i32
    %c0_i32_0 = arith.constant 0 : i32
    return %arg0, %c0_i32 : i32, i32
  }
  func.func @transform_4(%arg0: i32, %arg1: i32) -> (i32, i32) {
    %c0_i32 = arith.constant 0 : i32
    return %arg0, %arg1 : i32, i32
  }
  func.func @transform_5(%arg0: i32, %arg1: i32) -> (i32, i32) {
    %c0_i32 = arith.constant 0 : i32
    %c0_i32_0 = arith.constant 0 : i32
    return %arg0, %c0_i32 : i32, i32
  }
}

module attributes {stable_mosaic.version = 11 : i64} {
  func.func @_mix_scale_kernel(%arg0: i32, %arg1: i32, %arg2: memref<1xf32, #tpu.memory_space<smem>>, %arg3: memref<8x128xf32, #tpu.memory_space<vmem>>, %arg4: memref<8x1xi32, #tpu.memory_space<vmem>>, %arg5: memref<8x128xf32, #tpu.memory_space<vmem>>) attributes {dimension_semantics = [#tpu.dimension_semantics<parallel>, #tpu.dimension_semantics<parallel>], iteration_bounds = array<i64: 1, 1>, scalar_prefetch = 0 : i64, scratch_operands = 0 : i64, tpu.core_type = #tpu.core_type<tc>, window_params = [{transform_indices = @transform_0, window_bounds = array<i64: 1>}, {transform_indices = @transform_1, window_bounds = array<i64: 8, 128>}, {transform_indices = @transform_2, window_bounds = array<i64: 8, 1>}, {transform_indices = @transform_3, window_bounds = array<i64: 8, 128>}]} {
    %c0 = arith.constant 0 : index
    %c0_0 = arith.constant 0 : index
    %0 = vector.load %arg3[%c0, %c0_0] : memref<8x128xf32, #tpu.memory_space<vmem>>, vector<8x128xf32>
    %cst = arith.constant -0.99999988 : f32
    %cst_1 = arith.constant 0.99999988 : f32
    %1 = vector.broadcast %cst : f32 to vector<8x128xf32>
    %2 = arith.maximumf %1, %0 : vector<8x128xf32>
    %3 = vector.broadcast %cst_1 : f32 to vector<8x128xf32>
    %4 = arith.minimumf %3, %2 : vector<8x128xf32>
    %cst_2 = arith.constant 0.87758255 : f32
    %5 = vector.broadcast %cst_2 : f32 to vector<8x128xf32>
    %6 = arith.mulf %4, %5 : vector<8x128xf32>
    %7 = arith.mulf %4, %4 : vector<8x128xf32>
    %cst_3 = arith.constant 1.000000e+00 : f32
    %8 = vector.broadcast %cst_3 : f32 to vector<8x128xf32>
    %9 = arith.subf %8, %7 : vector<8x128xf32>
    %10 = math.sqrt %9 : vector<8x128xf32>
    %cst_4 = arith.constant 0.47942555 : f32
    %11 = vector.broadcast %cst_4 : f32 to vector<8x128xf32>
    %12 = arith.mulf %10, %11 : vector<8x128xf32>
    %13 = arith.subf %6, %12 : vector<8x128xf32>
    %c0_5 = arith.constant 0 : index
    %c0_6 = arith.constant 0 : index
    %14 = vector.load %arg4[%c0_5, %c0_6] : memref<8x1xi32, #tpu.memory_space<vmem>>, vector<8x1xi32>
    %15 = tpu.iota {dimensions = array<i32: 1>} : vector<8x128xi32>
    %c128_i32 = arith.constant 128 : i32
    %16 = arith.muli %arg1, %c128_i32 : i32
    %17 = vector.broadcast %16 : i32 to vector<8x128xi32>
    %18 = arith.addi %15, %17 : vector<8x128xi32>
    %19 = vector.broadcast %14 : vector<8x1xi32> to vector<8x128xi32>
    %20 = arith.cmpi eq, %18, %19 : vector<8x128xi32>
    %21 = arith.extui %20 : vector<8x128xi1> to vector<8x128xi32>
    %22 = arith.sitofp %21 : vector<8x128xi32> to vector<8x128xf32>
    %cst_7 = arith.constant 1.000000e+00 : f32
    %23 = vector.broadcast %cst_7 : f32 to vector<8x128xf32>
    %24 = arith.subf %23, %22 : vector<8x128xf32>
    %25 = arith.mulf %0, %24 : vector<8x128xf32>
    %26 = arith.mulf %13, %22 : vector<8x128xf32>
    %27 = arith.addf %25, %26 : vector<8x128xf32>
    %c0_8 = arith.constant 0 : index
    %28 = memref.load %arg2[%c0_8] : memref<1xf32, #tpu.memory_space<smem>>
    %29 = vector.broadcast %28 : f32 to vector<8x128xf32>
    %30 = arith.mulf %27, %29 : vector<8x128xf32>
    %c0_9 = arith.constant 0 : index
    %c0_10 = arith.constant 0 : index
    %31 = vector.load %arg5[%c0_9, %c0_10] : memref<8x128xf32, #tpu.memory_space<vmem>>, vector<8x128xf32>
    tpu.vector_store %arg5[%c0_9, %c0_10], %30 {strides = array<i32>} : memref<8x128xf32, #tpu.memory_space<vmem>>, vector<8x128xf32>,
    return
  }
  func.func @transform_0(%arg0: i32, %arg1: i32) -> i32 {
    %c0_i32 = arith.constant 0 : i32
    %c0_i32_0 = arith.constant 0 : i32
    return %c0_i32 : i32
  }
  func.func @transform_1(%arg0: i32, %arg1: i32) -> (i32, i32) {
    %c0_i32 = arith.constant 0 : i32
    return %arg0, %arg1 : i32, i32
  }
  func.func @transform_2(%arg0: i32, %arg1: i32) -> (i32, i32) {
    %c0_i32 = arith.constant 0 : i32
    %c0_i32_0 = arith.constant 0 : i32
    return %arg0, %c0_i32 : i32, i32
  }
  func.func @transform_3(%arg0: i32, %arg1: i32) -> (i32, i32) {
    %c0_i32 = arith.constant 0 : i32
    return %arg0, %arg1 : i32, i32
  }
}

</mosaic_0001>

<bundles_post_ra>
// kernel: adacos_forward.4
= control target key start
LH: loop header
LB: loop body
LE: loop exit
PB: predicated region body
PF: predicated region fallthrough
CT: control target
= control target key end

     0   :  { %s39_s0 = inlined_call_operand.vmem [shape: f32[8,128], index: 0, kind: input, shape index: {}]   ;;  %s40_s1 = inlined_call_operand.vmem [shape: bf16[8,128], index: 1, kind: output, shape index: {}]  }
   0x1   :  { %v8_v0 = vld [vmem:[%s39_s0] sm:$0xff] }
   0x2   :  { %v9_v1 = vmul.f32 %v8_v0, %v8_v0 }
   0x4   :  { %10 = vadd.xlane.f32.xlu0 %v9_v1 }
  0x8d   :  { %v11_v2 = vpop.xlane.xlu0 %10 }
  0x8e   :  { %v12_v3 = vmax.f32 %v11_v2, 1e-24 }
  0x90   :  { %21 = vrsqrt.f32 %v12_v3 }
  0x9d   :  { %v22_v4 = vpop.eup %21 }
  0x9e   :  { %v14_v5 = vmul.f32 %v22_v4, %v8_v0 }
  0xa0   :  { %v15_v6 = vpack.c.bf16 %v14_v5, %v14_v5 }
  0xa2   :  { %16 = vst [vmem:[%s40_s1] sm:$0xf] %v15_v6 }

// kernel: adacos_forward.5
= control target key start
LH: loop header
LB: loop body
LE: loop exit
PB: predicated region body
PF: predicated region fallthrough
CT: control target
= control target key end

     0   :  { %s477_s0 = inlined_call_operand.vmem [shape: f32[128,128], index: 0, kind: input, shape index: {}]   ;;  %s478_s1 = inlined_call_operand.vmem [shape: bf16[128,128], index: 1, kind: output, shape index: {}]  }
   0x1   :  { %v328_v0 = vld [vmem:[%s477_s0 + $0x10] sm:$0xff]  ;;  %v333_v1 = vld [vmem:[%s477_s0] sm:$0xff]  ;;  %v338_v2 = vld [vmem:[%s477_s0 + $0x18] sm:$0xff] }
   0x2   :  { %v26_v3 = vmul.f32 %v328_v0, %v328_v0  ;;  %v24_v4 = vmul.f32 %v333_v1, %v333_v1  ;;  %v347_v5 = vld [vmem:[%s477_s0 + $0x8] sm:$0xff]  ;;  %v27_v6 = vmul.f32 %v338_v2, %v338_v2  ;;  %v361_v9 = vld [vmem:[%s477_s0 + $0x20] sm:$0xff]  ;;  %v370_v12 = vld [vmem:[%s477_s0 + $0x38] sm:$0xff] }
   0x3   :  { %v25_v7 = vmul.f32 %v347_v5, %v347_v5  ;;  %v356_v8 = vld [vmem:[%s477_s0 + $0x28] sm:$0xff]  ;;  %v28_v11 = vmul.f32 %v361_v9, %v361_v9  ;;  %v375_v13 = vld [vmem:[%s477_s0 + $0x30] sm:$0xff]  ;;  %v31_v14 = vmul.f32 %v370_v12, %v370_v12  ;;  %v389_v17 = vld [vmem:[%s477_s0 + $0x40] sm:$0xff] }
   0x4   :  { %44 = vadd.xlane.f32.xlu1 %v26_v3  ;;  %40 = vadd.xlane.f32.xlu0 %v24_v4  ;;  %v29_v10 = vmul.f32 %v356_v8, %v356_v8  ;;  %v30_v15 = vmul.f32 %v375_v13, %v375_v13  ;;  %v384_v16 = vld [vmem:[%s477_s0 + $0x48] sm:$0xff]  ;;  %v32_v19 = vmul.f32 %v389_v17, %v389_v17  ;;  %v398_v20 = vld [vmem:[%s477_s0 + $0x58] sm:$0xff]  ;;  %v403_v21 = vld [vmem:[%s477_s0 + $0x50] sm:$0xff] }
   0x5   :  { %v33_v18 = vmul.f32 %v384_v16, %v384_v16  ;;  %v35_v22 = vmul.f32 %v398_v20, %v398_v20  ;;  %v34_v23 = vmul.f32 %v403_v21, %v403_v21  ;;  %v412_v24 = vld [vmem:[%s477_s0 + $0x68] sm:$0xff]  ;;  %v417_v25 = vld [vmem:[%s477_s0 + $0x60] sm:$0xff]  ;;  %v426_v28 = vld [vmem:[%s477_s0 + $0x78] sm:$0xff] }
   0x6   :  { %v37_v26 = vmul.f32 %v412_v24, %v412_v24  ;;  %v36_v27 = vmul.f32 %v417_v25, %v417_v25  ;;  %v431_v29 = vld [vmem:[%s477_s0 + $0x70] sm:$0xff]  ;;  %v39_v30 = vmul.f32 %v426_v28, %v426_v28 }
   0x7   :  { %v38_v31 = vmul.f32 %v431_v29, %v431_v29 }
   0x8   :  { %46 = vadd.xlane.f32.xlu1 %v27_v6  ;;  %42 = vadd.xlane.f32.xlu0 %v25_v7 }
   0xc   :  { %50 = vadd.xlane.f32.xlu1 %v29_v10  ;;  %48 = vadd.xlane.f32.xlu0 %v28_v11 }
  0x10   :  { %54 = vadd.xlane.f32.xlu1 %v31_v14  ;;  %52 = vadd.xlane.f32.xlu0 %v30_v15 }
  0x14   :  { %58 = vadd.xlane.f32.xlu1 %v33_v18  ;;  %56 = vadd.xlane.f32.xlu0 %v32_v19 }
  0x18   :  { %62 = vadd.xlane.f32.xlu1 %v35_v22  ;;  %60 = vadd.xlane.f32.xlu0 %v34_v23 }
  0x1c   :  { %66 = vadd.xlane.f32.xlu1 %v37_v26  ;;  %64 = vadd.xlane.f32.xlu0 %v36_v27 }
  0x20   :  { %70 = vadd.xlane.f32.xlu1 %v39_v30  ;;  %68 = vadd.xlane.f32.xlu0 %v38_v31 }
  0x8d   :  { %v45_v32 = vpop.xlane.xlu1 %44  ;;  %v41_v33 = vpop.xlane.xlu0 %40 }
  0x8e   :  { %v74_v34 = vmax.f32 %v45_v32, 1e-24  ;;  %v72_v35 = vmax.f32 %v41_v33, 1e-24 }
  0x90   :  { %283 = vrsqrt.f32 %v74_v34 }
  0x91   :  { %v47_v36 = vpop.xlane.xlu1 %46  ;;  %v43_v37 = vpop.xlane.xlu0 %42  ;;  %285 = vrsqrt.f32 %v72_v35 }
  0x92   :  { %v75_v38 = vmax.f32 %v47_v36, 1e-24  ;;  %v73_v39 = vmax.f32 %v43_v37, 1e-24 }
  0x94   :  { %287 = vrsqrt.f32 %v75_v38 }
  0x95   :  { %289 = vrsqrt.f32 %v73_v39  ;;  %v51_v40 = vpop.xlane.xlu1 %50  ;;  %v49_v41 = vpop.xlane.xlu0 %48 }
  0x96   :  { %v77_v42 = vmax.f32 %v51_v40, 1e-24  ;;  %v76_v43 = vmax.f32 %v49_v41, 1e-24 }
  0x98   :  { %291 = vrsqrt.f32 %v77_v42 }
  0x99   :  { %293 = vrsqrt.f32 %v76_v43  ;;  %v55_v44 = vpop.xlane.xlu1 %54  ;;  %v53_v45 = vpop.xlane.xlu0 %52 }
  0x9a   :  { %v79_v46 = vmax.f32 %v55_v44, 1e-24  ;;  %v78_v47 = vmax.f32 %v53_v45, 1e-24 }
  0x9c   :  { %295 = vrsqrt.f32 %v79_v46 }
  0x9d   :  { %297 = vrsqrt.f32 %v78_v47  ;;  %v59_v48 = vpop.xlane.xlu1 %58  ;;  %v57_v49 = vpop.xlane.xlu0 %56 }
  0x9e   :  { %v81_v50 = vmax.f32 %v59_v48, 1e-24  ;;  %v80_v51 = vmax.f32 %v57_v49, 1e-24  ;;  %v284_v52 = vpop.eup %283 }
  0x9f   :  { %v286_v53 = vpop.eup %285  ;;  %v106_v58 = vmul.f32 %v284_v52, %v328_v0 }
  0xa0   :  { %299 = vrsqrt.f32 %v81_v50  ;;  %v104_v62 = vmul.f32 %v286_v53, %v333_v1 }
  0xa1   :  { %v288_v54 = vpop.eup %287  ;;  %301 = vrsqrt.f32 %v80_v51  ;;  %v63_v55 = vpop.xlane.xlu1 %62 }
  0xa2   :  { %v61_v56 = vpop.xlane.xlu0 %60  ;;  %v290_v57 = vpop.eup %289  ;;  %v107_v59 = vmul.f32 %v288_v54, %v338_v2  ;;  %v83_v60 = vmax.f32 %v63_v55, 1e-24 }
  0xa3   :  { %v82_v61 = vmax.f32 %v61_v56, 1e-24  ;;  %v105_v63 = vmul.f32 %v290_v57, %v347_v5 }
  0xa4   :  { %v244_v3 = vpack.c.bf16 %v107_v59, %v106_v58  ;;  %303 = vrsqrt.f32 %v83_v60 }
  0xa5   :  { %v292_v4 = vpop.eup %291  ;;  %v239_v6 = vpack.c.bf16 %v105_v63, %v104_v62  ;;  %305 = vrsqrt.f32 %v82_v61  ;;  %v67_v7 = vpop.xlane.xlu1 %66 }
  0xa6   :  { %v65_v10 = vpop.xlane.xlu0 %64  ;;  %v294_v11 = vpop.eup %293  ;;  %276 = vst [vmem:[%s478_s1 + $0x8] sm:$0xff] %v244_v3   ;;  %v109_v0 = vmul.f32 %v292_v4, %v356_v8  ;;  %v85_v2 = vmax.f32 %v67_v7, 1e-24 }
  0xa7   :  { %v84_v14 = vmax.f32 %v65_v10, 1e-24  ;;  %240 = vst [vmem:[%s478_s1] sm:$0xff] %v239_v6   ;;  %v108_v1 = vmul.f32 %v294_v11, %v361_v9 }
  0xa8   :  { %307 = vrsqrt.f32 %v85_v2 }
  0xa9   :  { %v296_v5 = vpop.eup %295  ;;  %v249_v15 = vpack.c.bf16 %v109_v0, %v108_v1  ;;  %309 = vrsqrt.f32 %v84_v14  ;;  %v71_v18 = vpop.xlane.xlu1 %70 }
  0xaa   :  { %v69_v19 = vpop.xlane.xlu0 %68  ;;  %v298_v22 = vpop.eup %297  ;;  %v111_v23 = vmul.f32 %v296_v5, %v370_v12  ;;  %v87_v26 = vmax.f32 %v71_v18, 1e-24 }
  0xab   :  { %v86_v27 = vmax.f32 %v69_v19, 1e-24  ;;  %277 = vst [vmem:[%s478_s1 + $0x10] sm:$0xff] %v249_v15   ;;  %v110_v8 = vmul.f32 %v298_v22, %v375_v13 }
  0xac   :  { %311 = vrsqrt.f32 %v87_v26 }
  0xad   :  { %v300_v30 = vpop.eup %299  ;;  %v254_v9 = vpack.c.bf16 %v111_v23, %v110_v8  ;;  %313 = vrsqrt.f32 %v86_v27 }
  0xae   :  { %v302_v31 = vpop.eup %301  ;;  %v113_v32 = vmul.f32 %v300_v30, %v384_v16 }
  0xaf   :  { %278 = vst [vmem:[%s478_s1 + $0x18] sm:$0xff] %v254_v9   ;;  %v112_v12 = vmul.f32 %v302_v31, %v389_v17 }
  0xb1   :  { %v304_v33 = vpop.eup %303  ;;  %v259_v34 = vpack.c.bf16 %v113_v32, %v112_v12 }
  0xb2   :  { %v306_v35 = vpop.eup %305  ;;  %v115_v36 = vmul.f32 %v304_v33, %v398_v20 }
  0xb3   :  { %279 = vst [vmem:[%s478_s1 + $0x20] sm:$0xff] %v259_v34   ;;  %v114_v13 = vmul.f32 %v306_v35, %v403_v21 }
  0xb5   :  { %v308_v37 = vpop.eup %307  ;;  %v264_v38 = vpack.c.bf16 %v115_v36, %v114_v13 }
  0xb6   :  { %v310_v16 = vpop.eup %309  ;;  %v117_v39 = vmul.f32 %v308_v37, %v412_v24 }
  0xb7   :  { %280 = vst [vmem:[%s478_s1 + $0x28] sm:$0xff] %v264_v38   ;;  %v116_v17 = vmul.f32 %v310_v16, %v417_v25 }
  0xb9   :  { %v312_v40 = vpop.eup %311  ;;  %v269_v41 = vpack.c.bf16 %v117_v39, %v116_v17 }
  0xba   :  { %v314_v20 = vpop.eup %313  ;;  %v119_v42 = vmul.f32 %v312_v40, %v426_v28 }
  0xbb   :  { %281 = vst [vmem:[%s478_s1 + $0x30] sm:$0xff] %v269_v41   ;;  %v118_v21 = vmul.f32 %v314_v20, %v431_v29 }
  0xbd   :  { %v274_v43 = vpack.c.bf16 %v119_v42, %v118_v21 }
  0xbf   :  { %282 = vst [vmem:[%s478_s1 + $0x38] sm:$0xff] %v274_v43  }

// kernel: adacos_forward.6
= control target key start
LH: loop header
LB: loop body
LE: loop exit
PB: predicated region body
PF: predicated region fallthrough
CT: control target
= control target key end

     0   :  { %v221_v0 = vmov 0.0   ;;  %vm222_vm0 = vmmov 0   ;;  %v223_v2 = vmov 0   ;;  %v133_v16 = vlaneseq  ;;  %s293_s2 = inlined_call_operand.vmem [shape: bf16[128,128], index: 2, kind: input, shape index: {}]   ;;  %s294_s3 = inlined_call_operand.vmem [shape: s32[8,1], index: 3, kind: input, shape index: {}]   ;;  %s295_s1 = inlined_call_operand.vmem [shape: bf16[8,128], index: 1, kind: input, shape index: {}]   ;;  %s296_s4 = inlined_call_operand.vmem [shape: f32[8,128], index: 4, kind: output, shape index: {0}]   ;;  %s297_s0 = inlined_call_operand.<no memory space> [shape: f32[1], index: 0, kind: input, shape index: {}]   ;;  %s298_s5 = inlined_call_operand.vmem [shape: f32[8,128], index: 5, kind: output, shape index: {1}]  }
   0x1   :  { %187 = vmatprep.subr.bf16.mxu0 %v221_v0  ;;  %v211_v1 = vld [vmem:[%s293_s2 + $0x38] sm:$0xff]   ;;  %203 = vmatprep.mubr.msk.bf16.mxu0 %vm222_vm0, %v221_v0  ;;  %v212_v3 = vld [vmem:[%s293_s2 + $0x30] sm:$0xff]   ;;  %v132_v4 = vld [vmem:[%s294_s3] sm:$0xff]  ;;  %v154_v20 = vstv %s297_s0 }
   0x2   :  { %210 = vset.pattern.permute.xlu0 %v223_v2  ;;  %188 = vmatpush3.bf16.xpose.msra.mxu0 %v211_v1  ;;  %v213_v5 = vld [vmem:[%s293_s2 + $0x28] sm:$0xff]   ;;  %v214_v6 = vld [vmem:[%s293_s2 + $0x20] sm:$0xff]   ;;  %v215_v7 = vld [vmem:[%s293_s2 + $0x18] sm:$0xff]   ;;  %v134_v18 = vand.u32 127, %v133_v16 }
   0x3   :  { %189 = vmatprep.subr.bf16.mxu0 %v221_v0  ;;  %144 = vperm.xlu0 %210, %v132_v4   ;;  %v216_v8 = vld [vmem:[%s293_s2 + $0x10] sm:$0xff]   ;;  %v217_v9 = vld [vmem:[%s293_s2 + $0x8] sm:$0xff]   ;;  %v218_v10 = vld [vmem:[%s293_s2] sm:$0xff]  }
   0x4   :  { %v21_v11 = vld [vmem:[%s295_s1] sm:$0xf]  ;;  %vm147_vm2 = vcmp.lt.s32.totalorder %v134_v18, 16 }
   0xa   :  { %190 = vmatpush3.bf16.xpose.msra.mxu0 %v212_v3 }
   0xb   :  { %191 = vmatprep.subr.bf16.mxu0 %v221_v0 }
  0x12   :  { %192 = vmatpush3.bf16.xpose.msra.mxu0 %v213_v5 }
  0x13   :  { %193 = vmatprep.subr.bf16.mxu0 %v221_v0 }
  0x1a   :  { %194 = vmatpush3.bf16.xpose.msra.mxu0 %v214_v6 }
  0x1b   :  { %195 = vmatprep.subr.bf16.mxu0 %v221_v0 }
  0x22   :  { %196 = vmatpush3.bf16.xpose.msra.mxu0 %v215_v7 }
  0x23   :  { %197 = vmatprep.subr.bf16.mxu0 %v221_v0 }
  0x2a   :  { %198 = vmatpush3.bf16.xpose.msra.mxu0 %v216_v8 }
  0x2b   :  { %199 = vmatprep.subr.bf16.mxu0 %v221_v0 }
  0x32   :  { %200 = vmatpush3.bf16.xpose.msra.mxu0 %v217_v9 }
  0x33   :  { %201 = vmatprep.subr.bf16.mxu0 %v221_v0 }
  0x3a   :  { %202 = vmatpush3.bf16.xpose.msra.mxu0 %v218_v10 }
  0x41   :  { %204 = vmatmul.mubr.bf16.vlgmr.msra.gmra.mxu0 %v21_v11 }
  0x7e   :  { %v145_v19 = vpop.permute.xlu0 %144 }
  0x7f   :  { %vm146_vm1 = vcmp.ne.s32.totalorder %v134_v18, %v145_v19 }
  0x80   :  { %vm148_vm3 = vmand %vm146_vm1, %vm147_vm2 }
 0x101   :  { %v120_v12 = vpop.f32.mrf.mxu0 }
 0x102   :  { %126 = vst [vmem:[%s296_s4] sm:$0xff] %v120_v12  ;;  %v152_v13 = vmul.f32 1.442695, %v120_v12 }
 0x103   :  { %v205_v14 = vpop.f32.mrf.mxu0 }
 0x104   :  { %219 = vpow2.f32 %v152_v13 }
 0x105   :  { %v123_v15 = vpop.f32.mrf.mxu0 }
 0x107   :  { %v206_v17 = vpop.f32.mrf.mxu0 }
 0x111   :  { %v220_v21 = vpop.eup %219 }
 0x112   :  { %v155_v22 = vmul.f32 %v220_v21, %v154_v20 }
 0x114   :  { %v156_v23 = vsel %vm148_vm3, %v155_v22, 0.0 }
 0x115   :  { %158 = vadd.xlane.f32.xlu0 %v156_v23 }
 0x19e   :  { %v159_v24 = vpop.xlane.xlu0 %158 }
 0x19f   :  { %161 = vst [vmem:[%s298_s5] sm:$0xff] %v159_v24 }

// kernel: adacos_forward.7
= control target key start
LH: loop header
LB: loop body
LE: loop exit
PB: predicated region body
PF: predicated region fallthrough
CT: control target
= control target key end

     0   :  { %v61_v0 = vmov 0   ;;  %v31_v10 = vlaneseq  ;;  %v62_v17 = vmov 0.0   ;;  %s95_s2 = inlined_call_operand.vmem [shape: s32[8,1], index: 2, kind: input, shape index: {}]   ;;  %s96_s1 = inlined_call_operand.vmem [shape: f32[8,128], index: 1, kind: input, shape index: {}, may-alias: {1,3}]   ;;  %s97_s0 = inlined_call_operand.<no memory space> [shape: f32[1], index: 0, kind: input, shape index: {}]   ;;  %s98_s3 = inlined_call_operand.vmem [shape: f32[8,128], index: 3, kind: output, shape index: {}, may-alias: {1,3}]  }
   0x1   :  { %58 = vset.pattern.permute.xlu0 %v61_v0  ;;  %v30_v1 = vld [vmem:[%s95_s2] sm:$0xff]  ;;  %v47_v22 = vstv %s97_s0 }
   0x2   :  { %37 = vperm.xlu0 %58, %v30_v1   ;;  %v15_v2 = vld [vmem:[%s96_s1] sm:$0xff]  ;;  %v32_v12 = vand.u32 127, %v31_v10 }
   0x3   :  { %v54_v3 = vclamps-f32 %v15_v2, 0.9999999 }
   0x5   :  { %v19_v4 = vmul.f32 %v54_v3, %v54_v3  ;;  %v18_v13 = vmul.f32 0.87758255, %v54_v3 }
   0x7   :  { %v20_v5 = vsub.f32 1.0, %v19_v4 }
   0x9   :  { %59 = vrsqrt.f32 %v20_v5  ;;  %vm23_vm0 = vcmp.eq.f32.partialorder %v20_v5, inf  ;;  %v26_v8 = vand.u32 2147483648, %v20_v5  ;;  %vm25_vm1 = vcmp.eq.f32.partialorder %v20_v5, 0.0 }
  0x16   :  { %v60_v6 = vpop.eup %59 }
  0x17   :  { %v22_v7 = vmul.f32 %v60_v6, %v20_v5 }
  0x19   :  { %v24_v9 = vsel %vm23_vm0, %v20_v5, %v22_v7 }
  0x1a   :  { %v27_v11 = vsel %vm25_vm1, %v26_v8, %v24_v9 }
  0x1b   :  { %v28_v14 = vmul.f32 0.47942555, %v27_v11 }
  0x1d   :  { %v29_v16 = vsub.f32 %v18_v13, %v28_v14 }
  0x7d   :  { %v38_v15 = vpop.permute.xlu0 %37 }
  0x7e   :  { %vm39_vm2 = vcmp.eq.s32.totalorder %v32_v12, %v38_v15 }
  0x7f   :  { %v55_v18 = vsel %vm39_vm2, 1.0, %v62_v17 }
  0x80   :  { %v42_v19 = vsub.f32 1.0, %v55_v18  ;;  %v44_v21 = vmul.f32 %v55_v18, %v29_v16 }
  0x82   :  { %v43_v20 = vmul.f32 %v42_v19, %v15_v2 }
  0x84   :  { %v45_v23 = vadd.f32 %v44_v21, %v43_v20 }
  0x86   :  { %v48_v24 = vmul.f32 %v47_v22, %v45_v23 }
  0x88   :  { %49 = vst [vmem:[%s98_s3] sm:$0xff] %v48_v24 }

</bundles_post_ra>
